<compile_context>
chip_gen: v6e
topology: v6e:2x2x1
jax: 0.10.0
libtpu: 0.0.40
codegen_flags: <defaults>
</compile_context>

<pallas_src>
import functools

import jax
import jax.numpy as jnp
from jax.experimental import pallas as pl
from jax.experimental.pallas import tpu as pltpu

EPS = 1e-5


# ------------------------------------------------------------------ kernel ---
def _fused_conv_kernel(x_ref, w_ref, b_ref, *rest, kh, kw, stride, h_out, w_out,
                       relu, res_mode):
    """Fused 3x3 conv (im2col + one matmul) + folded-BN bias + residual/projection + ReLU.

    x_ref  : (1, s*s, Hps, Wps, Cin)  phase-split, padded input for one image
    w_ref  : (Ktot, Cout)             folded conv weights; for res_mode=="project" the
                                      1x1 shortcut weights are appended as extra rows
    b_ref  : (1, Cout)                folded BN bias (+ shortcut BN bias when projecting)
    r_ref  : (1, Ho*Wo, Cr)           residual (identity input, or strided x for project)
    o_ref  : (1, Ho*Wo, Cout)
    col_ref: (Ho*Wo, Ktot)            VMEM im2col scratch
    """
    if res_mode == "none":
        o_ref, col_ref = rest
        r_ref = None
    else:
        r_ref, o_ref, col_ref = rest

    c_in = x_ref.shape[-1]
    hw = h_out * w_out

    # Build the im2col LHS once: each of the 9 taps is a static shifted window of its
    # stride-phase plane, written into a contiguous column block of the scratch.
    for ih in range(kh):
        for iw in range(kw):
            p = (ih % stride) * stride + (iw % stride)     # stride phase of this tap
            dh, dw = ih // stride, iw // stride            # offset inside the phase plane
            plane = x_ref.at[0, p]                         # (Hps, Wps, Cin) view, zero cost
            tap = plane[dh:dh + h_out, dw:dw + w_out, :]   # static shifted window
            j = ih * kw + iw
            col_ref[:, j * c_in:(j + 1) * c_in] = tap.reshape(hw, c_in)
    if res_mode == "project":
        # Fuse the 1x1 projection shortcut as the "10th tap" of the same contraction.
        c_r = r_ref.shape[-1]
        col_ref[:, kh * kw * c_in:kh * kw * c_in + c_r] = r_ref[0]

    # Single big-K contraction on the MXU, f32 accumulation.
    out = jnp.dot(col_ref[...], w_ref[...], preferred_element_type=jnp.float32)
    out = out + b_ref[...].astype(jnp.float32)             # folded BN bias
    if res_mode == "add":                                   # identity shortcut
        out = out + r_ref[0].astype(jnp.float32)
    if relu:
        out = jnp.maximum(out, 0.0)
    o_ref[0] = out.astype(o_ref.dtype)                      # flat (Ho*Wo, Cout) store


# --------------------------------------------------------------- host glue ---
def _vmem_budget_bytes():
    """Generation-aware scoped-VMEM budget (~20% headroom for Mosaic internals)."""
    try:
        cap = int(getattr(pltpu.get_tpu_info(), "vmem_capacity_bytes", 64 << 20))
    except Exception:  # non-TPU tracing / older runtimes
        cap = 64 << 20
    return int(cap * 0.8)


def _fold_bn(w, bn):
    """Fold eval-mode BN scale into conv weights; return (w_folded, bias)."""
    scale = bn["gamma"] / jnp.sqrt(bn["var"] + EPS)
    return w * scale, bn["beta"] - bn["mean"] * scale


def _fused_conv_bn_act(x, w, bias, *, stride, relu, residual=None, w_res=None,
                       compute_dtype=jnp.float32):
    """Fused 3x3 conv + folded BN + optional residual / fused 1x1 projection + ReLU.

    x        : (B, H, W, Cin) NHWC
    w        : (9, Cin, Cout) conv weights with BN scale folded in (f32)
    bias     : (Cout,)        folded BN bias (f32)
    residual : None | (B, Ho*Wo, Cr) flattened residual input
    w_res    : None | (Cr, Cout) 1x1 projection weights (BN scale folded, f32)
    returns  : (B, Ho, Wo, Cout) in compute_dtype
    """
    b, h, w_sp, c_in = x.shape
    kh = kw = 3
    pad = 1
    c_out = w.shape[-1]
    h_out = (h + 2 * pad - kh) // stride + 1
    w_out = (w_sp + 2 * pad - kw) // stride + 1
    hw = h_out * w_out

    # Pad so every stride-phase plane has (h_out + 2) rows and a stride-aligned width,
    # then space-to-batch phase split (pure relayout, no duplication; a no-op for stride=1)
    # so every conv tap becomes a contiguous static slice inside the kernel.
    hp = stride * (h_out + 2)
    wp = -(-(w_sp + 2 * pad) // stride) * stride
    x = x.astype(compute_dtype)
    x_p = jnp.pad(x, ((0, 0), (pad, hp - h - pad), (pad, wp - w_sp - pad), (0, 0)))
    hps, wps = hp // stride, wp // stride
    n_phase = stride * stride
    x_ph = (x_p.reshape(b, hps, stride, wps, stride, c_in)
            .transpose(0, 2, 4, 1, 3, 5)
            .reshape(b, n_phase, hps, wps, c_in))

    res_mode = ("project" if w_res is not None
                else "add" if residual is not None else "none")

    # im2col weights: (9*Cin, Cout), with the 1x1 shortcut appended for the projection path.
    w_flat = w.reshape(kh * kw * c_in, c_out)
    if w_res is not None:
        w_flat = jnp.concatenate([w_flat, w_res], axis=0)
    w_flat = w_flat.astype(compute_dtype)
    k_total = w_flat.shape[0]

    kernel = functools.partial(_fused_conv_kernel, kh=kh, kw=kw, stride=stride,
                               h_out=h_out, w_out=w_out, relu=relu, res_mode=res_mode)

    in_specs = [
        pl.BlockSpec((1, n_phase, hps, wps, c_in), lambda bi: (bi, 0, 0, 0, 0)),
        pl.BlockSpec((k_total, c_out), lambda bi: (0, 0)),
        pl.BlockSpec((1, c_out), lambda bi: (0, 0)),
    ]
    args = [x_ph, w_flat, bias.reshape(1, -1).astype(jnp.float32)]
    if residual is not None:
        residual = residual.astype(compute_dtype)
        c_r = residual.shape[-1]
        in_specs.append(pl.BlockSpec((1, hw, c_r), lambda bi: (bi, 0, 0)))
        args.append(residual)

    out_spec = pl.BlockSpec((1, hw, c_out), lambda bi: (bi, 0, 0))

    # VMEM accounting for the full-image tile; inputs/outputs are double-buffered.
    isz = jnp.dtype(compute_dtype).itemsize
    est = (2 * n_phase * hps * wps * c_in * isz          # input tile (double-buffered)
           + hw * k_total * isz                          # im2col scratch
           + 2 * hw * c_out * isz                        # output tile (double-buffered)
           + (2 * hw * residual.shape[-1] * isz if residual is not None else 0)
           + 2 * (k_total * c_out * isz + c_out * 4)     # weights + bias
           + hw * c_out * 4)                             # f32 matmul result
    budget = _vmem_budget_bytes()
    assert est <= budget, (
        f"full-image tile needs ~{est >> 20} MiB VMEM > budget {budget >> 20} MiB; "
        "a row-tiled halo variant is required for this shape")

    y = pl.pallas_call(
        kernel,
        out_shape=jax.ShapeDtypeStruct((b, hw, c_out), compute_dtype),
        grid=(b,),
        in_specs=in_specs,
        out_specs=out_spec,
        scratch_shapes=[pltpu.VMEM((hw, k_total), compute_dtype)],
        compiler_params=pltpu.CompilerParams(
            dimension_semantics=("parallel",),
            vmem_limit_bytes=budget),
    )(*args)
    return y.reshape(b, h_out, w_out, c_out)


# -------------------------------------------------------- OrderedBasicBlock ---
def ordered_basic_block(x_nchw, params, *, stride, features=None, compute_dtype=None):
    """Forward pass of OrderedBasicBlock (eval-mode BN). NCHW in/out to match PyTorch."""
    if features is None:
        features = []
    if compute_dtype is None:
        compute_dtype = x_nchw.dtype
    x = jnp.transpose(x_nchw, (0, 2, 3, 1))        # NCHW -> NHWC (block boundary only)
    b, h, w_sp, c_in = x.shape
    c_out = params["w1"].shape[-1]

    # out1 = relu(bn1(conv1(x)))
    w1, b1 = _fold_bn(params["w1"], params["bn1"])
    out1 = _fused_conv_bn_act(x, w1, b1, stride=stride, relu=True,
                              compute_dtype=compute_dtype)
    features.append(jnp.transpose(out1, (0, 3, 1, 2)))

    # out = relu(bn2(conv2(out1)) + shortcut(x)) -- shortcut fused INTO the conv2 matmul
    w2, b2 = _fold_bn(params["w2"], params["bn2"])
    h_out, w_out = out1.shape[1], out1.shape[2]
    if stride != 1 or c_in != c_out:
        w_sc, b_sc = _fold_bn(params["w_sc"].reshape(c_in, c_out), params["bn_sc"])
        res = x[:, ::stride, ::stride, :].reshape(b, h_out * w_out, c_in)
        out = _fused_conv_bn_act(out1, w2, b2 + b_sc, stride=1, relu=True,
                                 residual=res, w_res=w_sc, compute_dtype=compute_dtype)
    else:
        res = x.reshape(b, h * w_sp, c_in)
        out = _fused_conv_bn_act(out1, w2, b2, stride=1, relu=True, residual=res,
                                 compute_dtype=compute_dtype)

    out_nchw = jnp.transpose(out, (0, 3, 1, 2))
    features.append(out_nchw)
    return out_nchw, features


# ---------------------------------------------------------------- reference ---
def _ref_conv_bn(x, w_hwio, bn, stride, pad, relu=False, residual=None):
    y = jax.lax.conv_general_dilated(
        x, w_hwio, (stride, stride), [(pad, pad), (pad, pad)],
        dimension_numbers=("NHWC", "HWIO", "NHWC"))
    y = (y - bn["mean"]) / jnp.sqrt(bn["var"] + EPS) * bn["gamma"] + bn["beta"]
    if residual is not None:
        y = y + residual
    if relu:
        y = jnp.maximum(y, 0.0)
    return y


def _ref_block(x_nchw, raw, stride, inter_dtype=None):
    x = jnp.transpose(x_nchw, (0, 2, 3, 1))
    c_in, c_out = raw["w1_hwio"].shape[2], raw["w1_hwio"].shape[3]
    out1 = _ref_conv_bn(x, raw["w1_hwio"], raw["bn1"], stride, 1, relu=True)
    if inter_dtype is not None:        # mimic the kernel's low-precision out1 storage
        out1 = out1.astype(inter_dtype).astype(jnp.float32)
    if stride != 1 or c_in != c_out:
        sc = _ref_conv_bn(x, raw["w_sc_hwio"], raw["bn_sc"], stride, 0)
    else:
        sc = x
    out = _ref_conv_bn(out1, raw["w2_hwio"], raw["bn2"], 1, 1, relu=True, residual=sc)
    return (jnp.transpose(out, (0, 3, 1, 2)),
            [jnp.transpose(out1, (0, 3, 1, 2)), jnp.transpose(out, (0, 3, 1, 2))])


# --------------------------------------------------------------------- main ---
def _make_bn(key, c):
    k1, k2, k3, k4 = jax.random.split(key, 4)
    return {
        "gamma": 1.0 + 0.1 * jax.random.normal(k1, (c,), jnp.float32),
        "beta": 0.1 * jax.random.normal(k2, (c,), jnp.float32),
        "mean": 0.1 * jax.random.normal(k3, (c,), jnp.float32),
        "var": 1.0 + 0.1 * jnp.abs(jax.random.normal(k4, (c,), jnp.float32)),
    }


def _make_block_params(key, c_in, c_out, with_shortcut):
    kw1, kw2, kwsc, kb1, kb2, kbsc = jax.random.split(key, 6)
    w1 = 0.1 * jax.random.normal(kw1, (3, 3, c_in, c_out), jnp.float32)
    w2 = 0.1 * jax.random.normal(kw2, (3, 3, c_out, c_out), jnp.float32)
    raw = {"w1_hwio": w1, "w2_hwio": w2,
           "bn1": _make_bn(kb1, c_out), "bn2": _make_bn(kb2, c_out)}
    params = {"w1": w1.reshape(9, c_in, c_out), "w2": w2.reshape(9, c_out, c_out),
              "bn1": raw["bn1"], "bn2": raw["bn2"]}
    if with_shortcut:
        wsc = 0.1 * jax.random.normal(kwsc, (1, 1, c_in, c_out), jnp.float32)
        raw["w_sc_hwio"] = wsc
        raw["bn_sc"] = _make_bn(kbsc, c_out)
        params["w_sc"] = wsc.reshape(1, c_in, c_out)
        params["bn_sc"] = raw["bn_sc"]
    return params, raw


def _round_weights(tree, dtype):
    keys = {"w1", "w2", "w_sc", "w1_hwio", "w2_hwio", "w_sc_hwio"}
    return {k: (v.astype(dtype).astype(jnp.float32) if k in keys else v)
            for k, v in tree.items()}


def _run_case(name, key, *, b, c_in, c_out, hw, stride,
              compute_dtype=jnp.float32, tol=5e-4):
    kx, kp = jax.random.split(key)
    x = jax.random.normal(kx, (b, c_in, hw, hw), jnp.float32)
    with_sc = (stride != 1 or c_in != c_out)
    params, raw = _make_block_params(kp, c_in, c_out, with_sc)

    inter = None
    if compute_dtype != jnp.float32:
        # Round inputs/weights once so the f32 reference sees the same values as the bf16
        # kernel; remaining diff is just the kernel's low-precision out1/out storage.
        x = x.astype(compute_dtype).astype(jnp.float32)
        params = _round_weights(params, compute_dtype)
        raw = _round_weights(raw, compute_dtype)
        inter = compute_dtype

    out, feats = ordered_basic_block(x, params, stride=stride,
                                     compute_dtype=compute_dtype)
    out = jax.block_until_ready(out)
    for f in feats:
        jax.block_until_ready(f)

    ref_out, ref_feats = _ref_block(x, raw, stride, inter_dtype=inter)
    ho = (hw - 1) // stride + 1
    assert out.shape == (b, c_out, ho, ho), (name, out.shape)
    assert len(feats) == 2

    def nerr(a, r):
        a = a.astype(jnp.float32)
        return float(jnp.max(jnp.abs(a - r) / (1.0 + jnp.abs(r))))

    err = max(nerr(out, ref_out), nerr(feats[0], ref_feats[0]))
    assert err < tol, (name, err)


if __name__ == "__main__":
    key = jax.random.PRNGKey(0)
    k1, k2 = jax.random.split(key)
    # Projection shortcut (stride=2, channel change), f32 -> tight numerics check of the
    # fused "10th tap" 1x1 projection path.
    _run_case("projection", k1, b=2, c_in=4, c_out=8, hw=16, stride=2,
              compute_dtype=jnp.float32, tol=5e-4)
    # Identity shortcut (stride=1, same width), bfloat16 data path with f32 accumulation.
    _run_case("identity", k2, b=2, c_in=8, c_out=8, hw=16, stride=1,
              compute_dtype=jnp.bfloat16, tol=2e-2)
    print("KERNEL_OK")
</pallas_src>

<mosaic_0001>
module attributes {stable_mosaic.version = 11 : i64} {
  func.func @_fused_conv_kernel(%arg0: i32, %arg1: memref<1x4x10x9x4xf32, #tpu.memory_space<vmem>>, %arg2: memref<36x8xf32, #tpu.memory_space<vmem>>, %arg3: memref<1x8xf32, #tpu.memory_space<vmem>>, %arg4: memref<1x64x8xf32, #tpu.memory_space<vmem>>, %arg5: memref<64x36xf32, #tpu.memory_space<vmem>>) attributes {dimension_semantics = [#tpu.dimension_semantics<parallel>], iteration_bounds = array<i64: 2>, scalar_prefetch = 0 : i64, scratch_operands = 1 : i64, tpu.core_type = #tpu.core_type<tc>, window_params = [{transform_indices = @transform_0, window_bounds = array<i64: 1, 4, 10, 9, 4>}, {pipeline_mode = #tpu.pipeline_mode<synchronous>, transform_indices = @transform_1, window_bounds = array<i64: 36, 8>}, {pipeline_mode = #tpu.pipeline_mode<synchronous>, transform_indices = @transform_2, window_bounds = array<i64: 1, 8>}, {transform_indices = @transform_3, window_bounds = array<i64: 1, 64, 8>}]} {
    %c0_i32 = arith.constant 0 : i32
    %c0_i32_0 = arith.constant 0 : i32
    %c0_i32_1 = arith.constant 0 : i32
    %c0_i32_2 = arith.constant 0 : i32
    %c0_i32_3 = arith.constant 0 : i32
    %0 = tpu.memref_slice %arg1[%c0_i32, %c0_i32_0, %c0_i32_1, %c0_i32_2, %c0_i32_3] : memref<1x4x10x9x4xf32, #tpu.memory_space<vmem>> -> memref<1x1x10x9x4xf32, #tpu.memory_space<vmem>>
    %1 = tpu.memref_squeeze %0 : memref<1x1x10x9x4xf32, #tpu.memory_space<vmem>> -> memref<10x9x4xf32, #tpu.memory_space<vmem>>
    %c0 = arith.constant 0 : index
    %c0_4 = arith.constant 0 : index
    %c0_5 = arith.constant 0 : index
    %2 = vector.load %1[%c0, %c0_4, %c0_5] : memref<10x9x4xf32, #tpu.memory_space<vmem>>, vector<8x8x4xf32>
    %3 = vector.shape_cast %2 : vector<8x8x4xf32> to vector<64x4xf32>
    %c0_6 = arith.constant 0 : index
    %c0_7 = arith.constant 0 : index
    %4 = vector.load %arg5[%c0_6, %c0_7] : memref<64x36xf32, #tpu.memory_space<vmem>>, vector<64x4xf32>
    tpu.vector_store %arg5[%c0_6, %c0_7], %3 {strides = array<i32>} : memref<64x36xf32, #tpu.memory_space<vmem>>, vector<64x4xf32>,
    %c0_i32_8 = arith.constant 0 : i32
    %c1_i32 = arith.constant 1 : i32
    %c0_i32_9 = arith.constant 0 : i32
    %c0_i32_10 = arith.constant 0 : i32
    %c0_i32_11 = arith.constant 0 : i32
    %5 = tpu.memref_slice %arg1[%c0_i32_8, %c1_i32, %c0_i32_9, %c0_i32_10, %c0_i32_11] : memref<1x4x10x9x4xf32, #tpu.memory_space<vmem>> -> memref<1x1x10x9x4xf32, #tpu.memory_space<vmem>>
    %6 = tpu.memref_squeeze %5 : memref<1x1x10x9x4xf32, #tpu.memory_space<vmem>> -> memref<10x9x4xf32, #tpu.memory_space<vmem>>
    %c0_12 = arith.constant 0 : index
    %c0_13 = arith.constant 0 : index
    %c0_14 = arith.constant 0 : index
    %7 = vector.load %6[%c0_12, %c0_13, %c0_14] : memref<10x9x4xf32, #tpu.memory_space<vmem>>, vector<8x8x4xf32>
    %8 = vector.shape_cast %7 : vector<8x8x4xf32> to vector<64x4xf32>
    %c0_15 = arith.constant 0 : index
    %c4 = arith.constant 4 : index
    %9 = vector.load %arg5[%c0_15, %c4] : memref<64x36xf32, #tpu.memory_space<vmem>>, vector<64x4xf32>
    tpu.vector_store %arg5[%c0_15, %c4], %8 {strides = array<i32>} : memref<64x36xf32, #tpu.memory_space<vmem>>, vector<64x4xf32>,
    %c0_i32_16 = arith.constant 0 : i32
    %c0_i32_17 = arith.constant 0 : i32
    %c0_i32_18 = arith.constant 0 : i32
    %c0_i32_19 = arith.constant 0 : i32
    %c0_i32_20 = arith.constant 0 : i32
    %10 = tpu.memref_slice %arg1[%c0_i32_16, %c0_i32_17, %c0_i32_18, %c0_i32_19, %c0_i32_20] : memref<1x4x10x9x4xf32, #tpu.memory_space<vmem>> -> memref<1x1x10x9x4xf32, #tpu.memory_space<vmem>>
    %11 = tpu.memref_squeeze %10 : memref<1x1x10x9x4xf32, #tpu.memory_space<vmem>> -> memref<10x9x4xf32, #tpu.memory_space<vmem>>
    %c0_21 = arith.constant 0 : index
    %c1 = arith.constant 1 : index
    %c0_22 = arith.constant 0 : index
    %12 = vector.load %11[%c0_21, %c1, %c0_22] : memref<10x9x4xf32, #tpu.memory_space<vmem>>, vector<8x8x4xf32>
    %13 = vector.shape_cast %12 : vector<8x8x4xf32> to vector<64x4xf32>
    %c0_23 = arith.constant 0 : index
    %c8 = arith.constant 8 : index
    %14 = vector.load %arg5[%c0_23, %c8] : memref<64x36xf32, #tpu.memory_space<vmem>>, vector<64x4xf32>
    tpu.vector_store %arg5[%c0_23, %c8], %13 {strides = array<i32>} : memref<64x36xf32, #tpu.memory_space<vmem>>, vector<64x4xf32>,
    %c0_i32_24 = arith.constant 0 : i32
    %c2_i32 = arith.constant 2 : i32
    %c0_i32_25 = arith.constant 0 : i32
    %c0_i32_26 = arith.constant 0 : i32
    %c0_i32_27 = arith.constant 0 : i32
    %15 = tpu.memref_slice %arg1[%c0_i32_24, %c2_i32, %c0_i32_25, %c0_i32_26, %c0_i32_27] : memref<1x4x10x9x4xf32, #tpu.memory_space<vmem>> -> memref<1x1x10x9x4xf32, #tpu.memory_space<vmem>>
    %16 = tpu.memref_squeeze %15 : memref<1x1x10x9x4xf32, #tpu.memory_space<vmem>> -> memref<10x9x4xf32, #tpu.memory_space<vmem>>
    %c0_28 = arith.constant 0 : index
    %c0_29 = arith.constant 0 : index
    %c0_30 = arith.constant 0 : index
    %17 = vector.load %16[%c0_28, %c0_29, %c0_30] : memref<10x9x4xf32, #tpu.memory_space<vmem>>, vector<8x8x4xf32>
    %18 = vector.shape_cast %17 : vector<8x8x4xf32> to vector<64x4xf32>
    %c0_31 = arith.constant 0 : index
    %c12 = arith.constant 12 : index
    %19 = vector.load %arg5[%c0_31, %c12] : memref<64x36xf32, #tpu.memory_space<vmem>>, vector<64x4xf32>
    tpu.vector_store %arg5[%c0_31, %c12], %18 {strides = array<i32>} : memref<64x36xf32, #tpu.memory_space<vmem>>, vector<64x4xf32>,
    %c0_i32_32 = arith.constant 0 : i32
    %c3_i32 = arith.constant 3 : i32
    %c0_i32_33 = arith.constant 0 : i32
    %c0_i32_34 = arith.constant 0 : i32
    %c0_i32_35 = arith.constant 0 : i32
    %20 = tpu.memref_slice %arg1[%c0_i32_32, %c3_i32, %c0_i32_33, %c0_i32_34, %c0_i32_35] : memref<1x4x10x9x4xf32, #tpu.memory_space<vmem>> -> memref<1x1x10x9x4xf32, #tpu.memory_space<vmem>>
    %21 = tpu.memref_squeeze %20 : memref<1x1x10x9x4xf32, #tpu.memory_space<vmem>> -> memref<10x9x4xf32, #tpu.memory_space<vmem>>
    %c0_36 = arith.constant 0 : index
    %c0_37 = arith.constant 0 : index
    %c0_38 = arith.constant 0 : index
    %22 = vector.load %21[%c0_36, %c0_37, %c0_38] : memref<10x9x4xf32, #tpu.memory_space<vmem>>, vector<8x8x4xf32>
    %23 = vector.shape_cast %22 : vector<8x8x4xf32> to vector<64x4xf32>
    %c0_39 = arith.constant 0 : index
    %c16 = arith.constant 16 : index
    %24 = vector.load %arg5[%c0_39, %c16] : memref<64x36xf32, #tpu.memory_space<vmem>>, vector<64x4xf32>
    tpu.vector_store %arg5[%c0_39, %c16], %23 {strides = array<i32>} : memref<64x36xf32, #tpu.memory_space<vmem>>, vector<64x4xf32>,
    %c0_i32_40 = arith.constant 0 : i32
    %c2_i32_41 = arith.constant 2 : i32
    %c0_i32_42 = arith.constant 0 : i32
    %c0_i32_43 = arith.constant 0 : i32
    %c0_i32_44 = arith.constant 0 : i32
    %25 = tpu.memref_slice %arg1[%c0_i32_40, %c2_i32_41, %c0_i32_42, %c0_i32_43, %c0_i32_44] : memref<1x4x10x9x4xf32, #tpu.memory_space<vmem>> -> memref<1x1x10x9x4xf32, #tpu.memory_space<vmem>>
    %26 = tpu.memref_squeeze %25 : memref<1x1x10x9x4xf32, #tpu.memory_space<vmem>> -> memref<10x9x4xf32, #tpu.memory_space<vmem>>
    %c0_45 = arith.constant 0 : index
    %c1_46 = arith.constant 1 : index
    %c0_47 = arith.constant 0 : index
    %27 = vector.load %26[%c0_45, %c1_46, %c0_47] : memref<10x9x4xf32, #tpu.memory_space<vmem>>, vector<8x8x4xf32>
    %28 = vector.shape_cast %27 : vector<8x8x4xf32> to vector<64x4xf32>
    %c0_48 = arith.constant 0 : index
    %c20 = arith.constant 20 : index
    %29 = vector.load %arg5[%c0_48, %c20] : memref<64x36xf32, #tpu.memory_space<vmem>>, vector<64x4xf32>
    tpu.vector_store %arg5[%c0_48, %c20], %28 {strides = array<i32>} : memref<64x36xf32, #tpu.memory_space<vmem>>, vector<64x4xf32>,
    %c0_i32_49 = arith.constant 0 : i32
    %c0_i32_50 = arith.constant 0 : i32
    %c0_i32_51 = arith.constant 0 : i32
    %c0_i32_52 = arith.constant 0 : i32
    %c0_i32_53 = arith.constant 0 : i32
    %30 = tpu.memref_slice %arg1[%c0_i32_49, %c0_i32_50, %c0_i32_51, %c0_i32_52, %c0_i32_53] : memref<1x4x10x9x4xf32, #tpu.memory_space<vmem>> -> memref<1x1x10x9x4xf32, #tpu.memory_space<vmem>>
    %31 = tpu.memref_squeeze %30 : memref<1x1x10x9x4xf32, #tpu.memory_space<vmem>> -> memref<10x9x4xf32, #tpu.memory_space<vmem>>
    %c1_54 = arith.constant 1 : index
    %c0_55 = arith.constant 0 : index
    %c0_56 = arith.constant 0 : index
    %32 = vector.load %31[%c1_54, %c0_55, %c0_56] : memref<10x9x4xf32, #tpu.memory_space<vmem>>, vector<8x8x4xf32>
    %33 = vector.shape_cast %32 : vector<8x8x4xf32> to vector<64x4xf32>
    %c0_57 = arith.constant 0 : index
    %c24 = arith.constant 24 : index
    %34 = vector.load %arg5[%c0_57, %c24] : memref<64x36xf32, #tpu.memory_space<vmem>>, vector<64x4xf32>
    tpu.vector_store %arg5[%c0_57, %c24], %33 {strides = array<i32>} : memref<64x36xf32, #tpu.memory_space<vmem>>, vector<64x4xf32>,
    %c0_i32_58 = arith.constant 0 : i32
    %c1_i32_59 = arith.constant 1 : i32
    %c0_i32_60 = arith.constant 0 : i32
    %c0_i32_61 = arith.constant 0 : i32
    %c0_i32_62 = arith.constant 0 : i32
    %35 = tpu.memref_slice %arg1[%c0_i32_58, %c1_i32_59, %c0_i32_60, %c0_i32_61, %c0_i32_62] : memref<1x4x10x9x4xf32, #tpu.memory_space<vmem>> -> memref<1x1x10x9x4xf32, #tpu.memory_space<vmem>>
    %36 = tpu.memref_squeeze %35 : memref<1x1x10x9x4xf32, #tpu.memory_space<vmem>> -> memref<10x9x4xf32, #tpu.memory_space<vmem>>
    %c1_63 = arith.constant 1 : index
    %c0_64 = arith.constant 0 : index
    %c0_65 = arith.constant 0 : index
    %37 = vector.load %36[%c1_63, %c0_64, %c0_65] : memref<10x9x4xf32, #tpu.memory_space<vmem>>, vector<8x8x4xf32>
    %38 = vector.shape_cast %37 : vector<8x8x4xf32> to vector<64x4xf32>
    %c0_66 = arith.constant 0 : index
    %c28 = arith.constant 28 : index
    %39 = vector.load %arg5[%c0_66, %c28] : memref<64x36xf32, #tpu.memory_space<vmem>>, vector<64x4xf32>
    tpu.vector_store %arg5[%c0_66, %c28], %38 {strides = array<i32>} : memref<64x36xf32, #tpu.memory_space<vmem>>, vector<64x4xf32>,
    %c0_i32_67 = arith.constant 0 : i32
    %c0_i32_68 = arith.constant 0 : i32
    %c0_i32_69 = arith.constant 0 : i32
    %c0_i32_70 = arith.constant 0 : i32
    %c0_i32_71 = arith.constant 0 : i32
    %40 = tpu.memref_slice %arg1[%c0_i32_67, %c0_i32_68, %c0_i32_69, %c0_i32_70, %c0_i32_71] : memref<1x4x10x9x4xf32, #tpu.memory_space<vmem>> -> memref<1x1x10x9x4xf32, #tpu.memory_space<vmem>>
    %41 = tpu.memref_squeeze %40 : memref<1x1x10x9x4xf32, #tpu.memory_space<vmem>> -> memref<10x9x4xf32, #tpu.memory_space<vmem>>
    %c1_72 = arith.constant 1 : index
    %c1_73 = arith.constant 1 : index
    %c0_74 = arith.constant 0 : index
    %42 = vector.load %41[%c1_72, %c1_73, %c0_74] : memref<10x9x4xf32, #tpu.memory_space<vmem>>, vector<8x8x4xf32>
    %43 = vector.shape_cast %42 : vector<8x8x4xf32> to vector<64x4xf32>
    %c0_75 = arith.constant 0 : index
    %c32 = arith.constant 32 : index
    %44 = vector.load %arg5[%c0_75, %c32] : memref<64x36xf32, #tpu.memory_space<vmem>>, vector<64x4xf32>
    tpu.vector_store %arg5[%c0_75, %c32], %43 {strides = array<i32>} : memref<64x36xf32, #tpu.memory_space<vmem>>, vector<64x4xf32>,
    %c0_76 = arith.constant 0 : index
    %c0_77 = arith.constant 0 : index
    %45 = vector.load %arg5[%c0_76, %c0_77] : memref<64x36xf32, #tpu.memory_space<vmem>>, vector<64x36xf32>
    %c0_78 = arith.constant 0 : index
    %c0_79 = arith.constant 0 : index
    %46 = vector.load %arg2[%c0_78, %c0_79] : memref<36x8xf32, #tpu.memory_space<vmem>>, vector<36x8xf32>
    %cst = arith.constant dense<0.000000e+00> : vector<64x8xf32>
    %47 = tpu.matmul %45, %46, %cst {dimension_numbers = #tpu.dot_dimension_numbers<[1], [0], [0], [1], [0, 0, 1, 1], [], []>} : vector<64x36xf32>, vector<36x8xf32>, vector<64x8xf32> -> vector<64x8xf32>
    %c0_80 = arith.constant 0 : index
    %c0_81 = arith.constant 0 : index
    %48 = vector.load %arg3[%c0_80, %c0_81] : memref<1x8xf32, #tpu.memory_space<vmem>>, vector<1x8xf32>
    %49 = vector.broadcast %48 : vector<1x8xf32> to vector<64x8xf32>
    %50 = arith.addf %47, %49 : vector<64x8xf32>
    %cst_82 = arith.constant 0.000000e+00 : f32
    %51 = vector.broadcast %cst_82 : f32 to vector<64x8xf32>
    %52 = arith.maximumf %50, %51 : vector<64x8xf32>
    %c0_83 = arith.constant 0 : index
    %c0_84 = arith.constant 0 : index
    %c0_85 = arith.constant 0 : index
    %53 = vector.load %arg4[%c0_83, %c0_84, %c0_85] : memref<1x64x8xf32, #tpu.memory_space<vmem>>, vector<1x64x8xf32>
    %54 = vector.shape_cast %53 : vector<1x64x8xf32> to vector<64x8xf32>
    %55 = vector.shape_cast %52 : vector<64x8xf32> to vector<1x64x8xf32>
    tpu.vector_store %arg4[%c0_83, %c0_84, %c0_85], %55 {strides = array<i32>} : memref<1x64x8xf32, #tpu.memory_space<vmem>>, vector<1x64x8xf32>,
    return
  }
  func.func @transform_0(%arg0: i32) -> (i32, i32, i32, i32, i32) {
    %c0_i32 = arith.constant 0 : i32
    %c0_i32_0 = arith.constant 0 : i32
    %c0_i32_1 = arith.constant 0 : i32
    %c0_i32_2 = arith.constant 0 : i32
    %c0_i32_3 = arith.constant 0 : i32
    return %arg0, %c0_i32, %c0_i32_0, %c0_i32_1, %c0_i32_2 : i32, i32, i32, i32, i32
  }
  func.func @transform_1(%arg0: i32) -> (i32, i32) {
    %c0_i32 = arith.constant 0 : i32
    %c0_i32_0 = arith.constant 0 : i32
    %c0_i32_1 = arith.constant 0 : i32
    return %c0_i32, %c0_i32_0 : i32, i32
  }
  func.func @transform_2(%arg0: i32) -> (i32, i32) {
    %c0_i32 = arith.constant 0 : i32
    %c0_i32_0 = arith.constant 0 : i32
    %c0_i32_1 = arith.constant 0 : i32
    return %c0_i32, %c0_i32_0 : i32, i32
  }
  func.func @transform_3(%arg0: i32) -> (i32, i32, i32) {
    %c0_i32 = arith.constant 0 : i32
    %c0_i32_0 = arith.constant 0 : i32
    %c0_i32_1 = arith.constant 0 : i32
    return %arg0, %c0_i32, %c0_i32_0 : i32, i32, i32
  }
}

</mosaic_0001>

<bundles_post_ra>
// kernel: tpu_custom_call.1
= control target key start
LH: loop header
LB: loop body
LE: loop exit
PB: predicated region body
PF: predicated region fallthrough
CT: control target
= control target key end

     0   :  { %s987_s12 = smov 0   ;;  %s1299_s0 = inlined_call_operand.vmem [shape: f32[2,4,10,9,4], index: 0, kind: input, shape index: {}]   ;;  %s1300_s1 = inlined_call_operand.vmem [shape: f32[36,8], index: 1, kind: input, shape index: {}]   ;;  %s1301_s2 = inlined_call_operand.vmem [shape: f32[1,8], index: 2, kind: input, shape index: {}]   ;;  %s1302_s3 = inlined_call_operand.vmem [shape: f32[2,64,8], index: 3, kind: output, shape index: {}]  }
   0x1 LB: > { %s812_s13 = sadd.s32 4294967295, %s957_s12   ;;  %p816_p0 = scmp.ge.s32.totalorder %s957_s12, 1  ;;  %s957_s12 = sphi %s987_s12, %s13_s12  }
   0x2   : > { %p137_p1 = scmp.lt.s32.totalorder %s957_s12, 3 }
   0x4   : > { %p138_p2 = pnand %p816_p0, %p137_p1 }
   0x5   : > { %p161_p3 = scmp.lt.s32.totalorder (!%p138_p2), %s812_s13, 1  ;;  %s959_s18 = smov (!%p138_p2), 4  }
   0x6   : > { %141 = sbr.rel (%p138_p2) target bundleno = 464 (0x1d0), region = 32  ;;  %s960_s19 = smov (!%p138_p2), 8  }
   0x7   : > { %s961_s20 = smov (!%p138_p2), 12   ;;  %s962_s21 = smov (!%p138_p2), 16  }
   0x8   : > { %s963_s22 = smov (!%p138_p2), 20   ;;  %s964_s23 = smov (!%p138_p2), 24  }
   0x9   : > { %s965_s24 = smov (!%p138_p2), 28   ;;  %s966_s4 = smov (!%p138_p2), 32  }
   0xb   : > { %s1304_s13 = smov (!%p161_p3, %s812_s13), 1  ;;  %vm179_vm0 = vcmask 31744   ;;  %v597_v42 = vld [vmem:[%s1300_s1 + $0x20] sm:$0xf]  ;;  %vm630_vm1 = vcmask 1043456   ;;  %v596_v43 = vld [vmem:[%s1300_s1 + $0x18] sm:$0xff] }
   0xc   : > { %s934_s14 = smul.u32 640, %s1304_s13  ;;  %902 = vmatprep.subr.msk.mxu0 %vm630_vm1, %v597_v42  ;;  %924 = vmatprep.subr.msk.mxu1 %vm630_vm1, %v597_v42  ;;  %v595_v44 = vld [vmem:[%s1300_s1 + $0x10] sm:$0xff]  ;;  %v594_v47 = vld [vmem:[%s1300_s1 + $0x8] sm:$0xff]  ;;  %v593_v48 = vld [vmem:[%s1300_s1] sm:$0xff]  ;;  %vm229_vm2 = vcmask 64544   ;;  %vm278_vm3 = vcmask 97344  }
   0xd   : > { %903 = vmatpush3.msk.msra.mxu0 %vm630_vm1, %v597_v42  ;;  %929 = vmatpush3.msk.msra.mxu1 %vm630_vm1, %v597_v42  ;;  %vm328_vm4 = vcmask 130144   ;;  %vm378_vm5 = vcmask 162944   ;;  %vm427_vm6 = vcmask 195744   ;;  %vm477_vm7 = vcmask 228544   ;;  %s888_s11 = sshll.u32 %s1304_s13, 6 }
   0xe   : > { %s1001_s17 = scalar_lea.vmem %s1299_s0, %s934_s14  ;;  %904 = vmatprep.subr.mxu0 %v596_v43  ;;  %925 = vmatprep.subr.mxu1 %v596_v43  ;;  %vm527_vm8 = vcmask 261344   ;;  %vm576_vm9 = vcmask 294144   ;;  %vm605_vm10 = vcmask 293888   ;;  %s170_s16 = scalar_lea.vmem %s1302_s3, %s888_s11  ;;  %vm747_vm11 = vcmask 64512  }
   0xf   : > { %v1004_v0 = vld [vmem:[%s1001_s17 + $0xb0] sm:$0xff]  ;;  %v820_v1 = vld [vmem:[%s1001_s17 + $0xa0] sm:$0xff]  ;;  %905 = vmatpush3.msra.mxu0 %v596_v43  ;;  %930 = vmatpush3.msra.mxu1 %v596_v43 }
  0x10   : > { %207 = vrot.lane.b32.xlu1 %v1004_v0, %s959_s18  ;;  %205 = vrot.lane.b32.xlu0 %v820_v1, %s959_s18  ;;  %v1011_v2 = vld [vmem:[%s1001_s17 + $0xf0] sm:$0xff]  ;;  %v1014_v3 = vld [vmem:[%s1001_s17 + $0xe0] sm:$0xff] }
  0x11   : > { %v1021_v4 = vld [vmem:[%s1001_s17 + $0x41] sm:$0xff]  ;;  %v856_v6 = vld [vmem:[%s1001_s17 + $0x50] sm:$0xff]  ;;  %906 = vmatprep.subr.mxu0 %v595_v44  ;;  %926 = vmatprep.subr.mxu1 %v595_v44 }
  0x12   : > { %v238_v5 = vld [vmem:[%s1001_s17 + $0x1] sm:$0xff]  ;;  %v1029_v7 = vld [vmem:[%s1001_s17 + $0x51] sm:$0xff]  ;;  %185 = vst.msk [vmem:[#allocation2 + $0x28] sm:$0xff] %vm179_vm0, %v856_v6  ;;  %907 = vmatpush3.msra.mxu0 %v595_v44  ;;  %931 = vmatpush3.msra.mxu1 %v595_v44 }
  0x13   : > { %v1032_v8 = vld [vmem:[%s1001_s17 + $0x11] sm:$0xff]  ;;  %v1037_v10 = vld [vmem:[%s1001_s17 + $0x60] sm:$0xff]  ;;  %908 = vmatprep.subr.mxu0 %v594_v47  ;;  %927 = vmatprep.subr.mxu1 %v594_v47 }
  0x14   : > { %215 = vrot.lane.b32.xlu1 %v1011_v2, %s959_s18  ;;  %213 = vrot.lane.b32.xlu0 %v1014_v3, %s959_s18  ;;  %v852_v9 = vld [vmem:[%s1001_s17 + $0x10] sm:$0xff]  ;;  %v1041_v11 = vld [vmem:[%s1001_s17 + $0x20] sm:$0xff]  ;;  %186 = vst.msk [vmem:[#allocation2 + $0x30] sm:$0xff] %vm179_vm0, %v1037_v10 }
  0x15   : > { %181 = vst.msk [vmem:[#allocation2 + $0x8] sm:$0xff] %vm179_vm0, %v852_v9  ;;  %182 = vst.msk [vmem:[#allocation2 + $0x10] sm:$0xff] %vm179_vm0, %v1041_v11  ;;  %v832_v12 = vld [vmem:[%s1001_s17 + $0x180] sm:$0xff]  ;;  %v1054_v14 = vld [vmem:[%s1001_s17 + $0x70] sm:$0xff]  ;;  %909 = vmatpush3.msra.mxu0 %v594_v47  ;;  %932 = vmatpush3.msra.mxu1 %v594_v47 }
  0x16   : > { %v828_v13 = vld [vmem:[%s1001_s17 + $0x140] sm:$0xff]  ;;  %v1057_v15 = vld [vmem:[%s1001_s17 + $0x30] sm:$0xff]  ;;  %187 = vst.msk [vmem:[#allocation2 + $0x38] sm:$0xff] %vm179_vm0, %v1054_v14  ;;  %910 = vmatprep.subr.mxu0 %v593_v48  ;;  %928 = vmatprep.subr.mxu1 %v593_v48 }
  0x17   : > { %v1062_v16 = vld [vmem:[%s1001_s17 + $0x40] sm:$0xff]  ;;  %183 = vst.msk [vmem:[#allocation2 + $0x18] sm:$0xff] %vm179_vm0, %v1057_v15  ;;  %v833_v18 = vld [vmem:[%s1001_s17 + $0x190] sm:$0xff]  ;;  %911 = vmatpush3.msra.mxu0 %v593_v48  ;;  %933 = vmatpush3.msra.mxu1 %v593_v48 }
  0x18   : > { %262 = vrot.lane.b32.xlu1 %v1021_v4, %s960_s19  ;;  %254 = vrot.lane.b32.xlu0 %v238_v5, %s960_s19  ;;  %v171_v17 = vld [vmem:[%s1001_s17] sm:$0xff]  ;;  %v829_v19 = vld [vmem:[%s1001_s17 + $0x150] sm:$0xff]  ;;  %184 = vst.msk [vmem:[#allocation2 + $0x20] sm:$0xff] %vm179_vm0, %v1062_v16 }
  0x19   : > { %180 = vst.msk [vmem:[#allocation2] sm:$0xff] %vm179_vm0, %v171_v17  ;;  %v840_v20 = vld [vmem:[%s1001_s17 + $0x220] sm:$0xff]  ;;  %v841_v24 = vld [vmem:[%s1001_s17 + $0x230] sm:$0xff] }
  0x1a   : > { %v836_v21 = vld [vmem:[%s1001_s17 + $0x1e0] sm:$0xff]  ;;  %v837_v25 = vld [vmem:[%s1001_s17 + $0x1f0] sm:$0xff] }
  0x1b   : > { %v826_v22 = vld [vmem:[%s1001_s17 + $0x100] sm:$0xff]  ;;  %v1093_v28 = vld [vmem:[%s1001_s17 + $0x110] sm:$0xff] }
  0x1c   : > { %264 = vrot.lane.b32.xlu1 %v1029_v7, %s960_s19  ;;  %256 = vrot.lane.b32.xlu0 %v1032_v8, %s960_s19  ;;  %v822_v23 = vld [vmem:[%s1001_s17 + $0xc0] sm:$0xff]  ;;  %v1096_v29 = vld [vmem:[%s1001_s17 + $0xd0] sm:$0xff] }
  0x1d   : > { %v848_v26 = vld [vmem:[%s1001_s17 + $0x181] sm:$0xff]  ;;  %v849_v32 = vld [vmem:[%s1001_s17 + $0x191] sm:$0xff] }
  0x1e   : > { %v844_v27 = vld [vmem:[%s1001_s17 + $0x141] sm:$0xff]  ;;  %v845_v33 = vld [vmem:[%s1001_s17 + $0x151] sm:$0xff] }
  0x1f   : > { %v1103_v30 = vld [vmem:[%s1001_s17 + $0x61] sm:$0xff]  ;;  %v1119_v34 = vld [vmem:[%s1001_s17 + $0x71] sm:$0xff] }
  0x20   : > { %312 = vrot.lane.b32.xlu1 %v832_v12, %s961_s20  ;;  %304 = vrot.lane.b32.xlu0 %v828_v13, %s961_s20  ;;  %v1106_v31 = vld [vmem:[%s1001_s17 + $0x21] sm:$0xff]  ;;  %v1122_v35 = vld [vmem:[%s1001_s17 + $0x31] sm:$0xff] }
  0x21   : > { %v834_v36 = vld [vmem:[%s1001_s17 + $0x1a0] sm:$0xff]  ;;  %v835_v38 = vld [vmem:[%s1001_s17 + $0x1b0] sm:$0xff] }
  0x22   : > { %v830_v37 = vld [vmem:[%s1001_s17 + $0x160] sm:$0xff]  ;;  %v831_v39 = vld [vmem:[%s1001_s17 + $0x170] sm:$0xff] }
  0x23   : > { %v842_v40 = vld [vmem:[%s1001_s17 + $0x240] sm:$0xff]  ;;  %v843_v45 = vld [vmem:[%s1001_s17 + $0x250] sm:$0xff] }
  0x24   : > { %314 = vrot.lane.b32.xlu1 %v833_v18, %s961_s20  ;;  %306 = vrot.lane.b32.xlu0 %v829_v19, %s961_s20  ;;  %v838_v41 = vld [vmem:[%s1001_s17 + $0x200] sm:$0xff]  ;;  %v839_v46 = vld [vmem:[%s1001_s17 + $0x210] sm:$0xff] }
  0x25   : > { %v850_v49 = vld [vmem:[%s1001_s17 + $0x1a1] sm:$0xff]  ;;  %v851_v51 = vld [vmem:[%s1001_s17 + $0x1b1] sm:$0xff] }
  0x26   : > { %v846_v50 = vld [vmem:[%s1001_s17 + $0x161] sm:$0xff]  ;;  %v847_v52 = vld [vmem:[%s1001_s17 + $0x171] sm:$0xff] }
  0x27   : > { %v859_v53 = vld [vmem:[%s1001_s17 + $0x80] sm:$0xff] }
  0x28   : > { %362 = vrot.lane.b32.xlu1 %v840_v20, %s962_s21  ;;  %354 = vrot.lane.b32.xlu0 %v836_v21, %s962_s21  ;;  %v867_v54 = vld [vmem:[%s1001_s17 + $0x120] sm:$0xff] }
  0x29   : > { %v875_v59 = vld [vmem:[%s1001_s17 + $0x81] sm:$0xff] }
  0x2c   : > { %217 = vrot.lane.b32.xlu1 %v826_v22, %s959_s18  ;;  %209 = vrot.lane.b32.xlu0 %v822_v23, %s959_s18 }
  0x30   : > { %364 = vrot.lane.b32.xlu1 %v841_v24, %s962_s21  ;;  %356 = vrot.lane.b32.xlu0 %v837_v25, %s962_s21 }
  0x34   : > { %411 = vrot.lane.b32.xlu1 %v848_v26, %s963_s22  ;;  %403 = vrot.lane.b32.xlu0 %v844_v27, %s963_s22 }
  0x38   : > { %219 = vrot.lane.b32.xlu1 %v1093_v28, %s959_s18  ;;  %211 = vrot.lane.b32.xlu0 %v1096_v29, %s959_s18 }
  0x3c   : > { %266 = vrot.lane.b32.xlu1 %v1103_v30, %s960_s19  ;;  %258 = vrot.lane.b32.xlu0 %v1106_v31, %s960_s19 }
  0x40   : > { %413 = vrot.lane.b32.xlu1 %v849_v32, %s963_s22  ;;  %405 = vrot.lane.b32.xlu0 %v845_v33, %s963_s22 }
  0x44   : > { %461 = vrot.lane.b32.xlu1 %v856_v6, %s964_s23  ;;  %453 = vrot.lane.b32.xlu0 %v852_v9, %s964_s23 }
  0x48   : > { %268 = vrot.lane.b32.xlu1 %v1119_v34, %s960_s19  ;;  %260 = vrot.lane.b32.xlu0 %v1122_v35, %s960_s19 }
  0x4c   : > { %316 = vrot.lane.b32.xlu1 %v834_v36, %s961_s20  ;;  %308 = vrot.lane.b32.xlu0 %v830_v37, %s961_s20 }
  0x50   : > { %463 = vrot.lane.b32.xlu1 %v1037_v10, %s964_s23  ;;  %455 = vrot.lane.b32.xlu0 %v1041_v11, %s964_s23 }
  0x54   : > { %511 = vrot.lane.b32.xlu1 %v1011_v2, %s965_s24  ;;  %503 = vrot.lane.b32.xlu0 %v1004_v0, %s965_s24 }
  0x58   : > { %318 = vrot.lane.b32.xlu1 %v835_v38, %s961_s20  ;;  %310 = vrot.lane.b32.xlu0 %v831_v39, %s961_s20 }
  0x5c   : > { %366 = vrot.lane.b32.xlu1 %v842_v40, %s962_s21  ;;  %358 = vrot.lane.b32.xlu0 %v838_v41, %s962_s21 }
  0x60   : > { %513 = vrot.lane.b32.xlu1 %v826_v22, %s965_s24  ;;  %505 = vrot.lane.b32.xlu0 %v822_v23, %s965_s24 }
  0x64   : > { %560 = vrot.lane.b32.xlu1 %v1029_v7, %s966_s4  ;;  %552 = vrot.lane.b32.xlu0 %v1032_v8, %s966_s4 }
  0x68   : > { %368 = vrot.lane.b32.xlu1 %v843_v45, %s962_s21  ;;  %360 = vrot.lane.b32.xlu0 %v839_v46, %s962_s21 }
  0x6c   : > { %415 = vrot.lane.b32.xlu1 %v850_v49, %s963_s22  ;;  %407 = vrot.lane.b32.xlu0 %v846_v50, %s963_s22 }
  0x70   : > { %562 = vrot.lane.b32.xlu1 %v1103_v30, %s966_s4  ;;  %554 = vrot.lane.b32.xlu0 %v1106_v31, %s966_s4 }
  0x74   : > { %417 = vrot.lane.b32.xlu1 %v851_v51, %s963_s22  ;;  %409 = vrot.lane.b32.xlu0 %v847_v52, %s963_s22 }
  0x78   : > { %465 = vrot.lane.b32.xlu1 %v1054_v14, %s964_s23  ;;  %457 = vrot.lane.b32.xlu0 %v1057_v15, %s964_s23 }
  0x7c   : > { %467 = vrot.lane.b32.xlu1 %v859_v53, %s964_s23  ;;  %459 = vrot.lane.b32.xlu0 %v1062_v16, %s964_s23 }
  0x80   : > { %515 = vrot.lane.b32.xlu1 %v1093_v28, %s965_s24  ;;  %507 = vrot.lane.b32.xlu0 %v1096_v29, %s965_s24 }
  0x82   : > { %v208_v55 = vpop.permute.xlu1 %207  ;;  %v206_v56 = vpop.permute.xlu0 %205 }
  0x83   : > { %231 = vst.msk [vmem:[#allocation2 + $0x8] sm:$0xff] %vm229_vm2, %v208_v55  ;;  %230 = vst.msk [vmem:[#allocation2] sm:$0xff] %vm229_vm2, %v206_v56 }
  0x84   : > { %517 = vrot.lane.b32.xlu1 %v867_v54, %s965_s24  ;;  %509 = vrot.lane.b32.xlu0 %v1014_v3, %s965_s24 }
  0x86   : > { %v216_v57 = vpop.permute.xlu1 %215  ;;  %v214_v58 = vpop.permute.xlu0 %213 }
  0x87   : > { %235 = vst.msk [vmem:[#allocation2 + $0x28] sm:$0xff] %vm229_vm2, %v216_v57  ;;  %234 = vst.msk [vmem:[#allocation2 + $0x20] sm:$0xff] %vm229_vm2, %v214_v58 }
  0x88   : > { %564 = vrot.lane.b32.xlu1 %v1119_v34, %s966_s4  ;;  %556 = vrot.lane.b32.xlu0 %v1122_v35, %s966_s4 }
  0x8a   : > { %v263_v60 = vpop.permute.xlu1 %262  ;;  %v255_v61 = vpop.permute.xlu0 %254 }
  0x8b   : > { %283 = vst.msk [vmem:[#allocation2 + $0x20] sm:$0xff] %vm278_vm3, %v263_v60  ;;  %279 = vst.msk [vmem:[#allocation2] sm:$0xff] %vm278_vm3, %v255_v61 }
  0x8c   : > { %566 = vrot.lane.b32.xlu1 %v875_v59, %s966_s4  ;;  %558 = vrot.lane.b32.xlu0 %v1021_v4, %s966_s4 }
  0x8e   : > { %v265_v62 = vpop.permute.xlu1 %264  ;;  %v257_v63 = vpop.permute.xlu0 %256 }
  0x8f   : > { %284 = vst.msk [vmem:[#allocation2 + $0x28] sm:$0xff] %vm278_vm3, %v265_v62  ;;  %280 = vst.msk [vmem:[#allocation2 + $0x8] sm:$0xff] %vm278_vm3, %v257_v63 }
  0x92   : > { %v313_v0 = vpop.permute.xlu1 %312  ;;  %v305_v1 = vpop.permute.xlu0 %304 }
  0x93   : > { %333 = vst.msk [vmem:[#allocation2 + $0x20] sm:$0xff] %vm328_vm4, %v313_v0  ;;  %329 = vst.msk [vmem:[#allocation2] sm:$0xff] %vm328_vm4, %v305_v1  ;;  %v876_v0 = vld [vmem:[%s1301_s2] ss:$0 sm:$0xff] }
  0x96   : > { %v315_v2 = vpop.permute.xlu1 %314  ;;  %v307_v3 = vpop.permute.xlu0 %306 }
  0x97   : > { %334 = vst.msk [vmem:[#allocation2 + $0x28] sm:$0xff] %vm328_vm4, %v315_v2  ;;  %330 = vst.msk [vmem:[#allocation2 + $0x8] sm:$0xff] %vm328_vm4, %v307_v3 }
  0x9a   : > { %v363_v4 = vpop.permute.xlu1 %362  ;;  %v355_v5 = vpop.permute.xlu0 %354 }
  0x9b   : > { %383 = vst.msk [vmem:[#allocation2 + $0x20] sm:$0xff] %vm378_vm5, %v363_v4  ;;  %379 = vst.msk [vmem:[#allocation2] sm:$0xff] %vm378_vm5, %v355_v5 }
  0x9e   : > { %v218_v6 = vpop.permute.xlu1 %217  ;;  %v210_v7 = vpop.permute.xlu0 %209 }
  0x9f   : > { %236 = vst.msk [vmem:[#allocation2 + $0x30] sm:$0xff] %vm229_vm2, %v218_v6  ;;  %232 = vst.msk [vmem:[#allocation2 + $0x10] sm:$0xff] %vm229_vm2, %v210_v7 }
  0xa2   : > { %v365_v8 = vpop.permute.xlu1 %364  ;;  %v357_v9 = vpop.permute.xlu0 %356 }
  0xa3   : > { %384 = vst.msk [vmem:[#allocation2 + $0x28] sm:$0xff] %vm378_vm5, %v365_v8  ;;  %380 = vst.msk [vmem:[#allocation2 + $0x8] sm:$0xff] %vm378_vm5, %v357_v9 }
  0xa6   : > { %v412_v10 = vpop.permute.xlu1 %411  ;;  %v404_v11 = vpop.permute.xlu0 %403 }
  0xa7   : > { %432 = vst.msk [vmem:[#allocation2 + $0x20] sm:$0xff] %vm427_vm6, %v412_v10  ;;  %428 = vst.msk [vmem:[#allocation2] sm:$0xff] %vm427_vm6, %v404_v11 }
  0xaa   : > { %v220_v12 = vpop.permute.xlu1 %219  ;;  %v212_v13 = vpop.permute.xlu0 %211 }
  0xab   : > { %237 = vst.msk [vmem:[#allocation2 + $0x38] sm:$0xff] %vm229_vm2, %v220_v12  ;;  %233 = vst.msk [vmem:[#allocation2 + $0x18] sm:$0xff] %vm229_vm2, %v212_v13 }
  0xae   : > { %v267_v14 = vpop.permute.xlu1 %266  ;;  %v259_v15 = vpop.permute.xlu0 %258 }
  0xaf   : > { %285 = vst.msk [vmem:[#allocation2 + $0x30] sm:$0xff] %vm278_vm3, %v267_v14  ;;  %281 = vst.msk [vmem:[#allocation2 + $0x10] sm:$0xff] %vm278_vm3, %v259_v15 }
  0xb2   : > { %v414_v16 = vpop.permute.xlu1 %413  ;;  %v406_v17 = vpop.permute.xlu0 %405 }
  0xb3   : > { %433 = vst.msk [vmem:[#allocation2 + $0x28] sm:$0xff] %vm427_vm6, %v414_v16  ;;  %429 = vst.msk [vmem:[#allocation2 + $0x8] sm:$0xff] %vm427_vm6, %v406_v17 }
  0xb6   : > { %v462_v18 = vpop.permute.xlu1 %461  ;;  %v454_v19 = vpop.permute.xlu0 %453 }
  0xb7   : > { %482 = vst.msk [vmem:[#allocation2 + $0x20] sm:$0xff] %vm477_vm7, %v462_v18  ;;  %478 = vst.msk [vmem:[#allocation2] sm:$0xff] %vm477_vm7, %v454_v19 }
  0xba   : > { %v269_v20 = vpop.permute.xlu1 %268  ;;  %v261_v21 = vpop.permute.xlu0 %260 }
  0xbb   : > { %286 = vst.msk [vmem:[#allocation2 + $0x38] sm:$0xff] %vm278_vm3, %v269_v20  ;;  %282 = vst.msk [vmem:[#allocation2 + $0x18] sm:$0xff] %vm278_vm3, %v261_v21 }
  0xbe   : > { %v317_v22 = vpop.permute.xlu1 %316  ;;  %v309_v23 = vpop.permute.xlu0 %308 }
  0xbf   : > { %335 = vst.msk [vmem:[#allocation2 + $0x30] sm:$0xff] %vm328_vm4, %v317_v22  ;;  %331 = vst.msk [vmem:[#allocation2 + $0x10] sm:$0xff] %vm328_vm4, %v309_v23 }
  0xc2   : > { %v464_v24 = vpop.permute.xlu1 %463  ;;  %v456_v25 = vpop.permute.xlu0 %455 }
  0xc3   : > { %483 = vst.msk [vmem:[#allocation2 + $0x28] sm:$0xff] %vm477_vm7, %v464_v24  ;;  %479 = vst.msk [vmem:[#allocation2 + $0x8] sm:$0xff] %vm477_vm7, %v456_v25 }
  0xc6   : > { %v512_v26 = vpop.permute.xlu1 %511  ;;  %v504_v27 = vpop.permute.xlu0 %503 }
  0xc7   : > { %532 = vst.msk [vmem:[#allocation2 + $0x20] sm:$0xff] %vm527_vm8, %v512_v26  ;;  %528 = vst.msk [vmem:[#allocation2] sm:$0xff] %vm527_vm8, %v504_v27 }
  0xca   : > { %v319_v28 = vpop.permute.xlu1 %318  ;;  %v311_v29 = vpop.permute.xlu0 %310 }
  0xcb   : > { %336 = vst.msk [vmem:[#allocation2 + $0x38] sm:$0xff] %vm328_vm4, %v319_v28  ;;  %332 = vst.msk [vmem:[#allocation2 + $0x18] sm:$0xff] %vm328_vm4, %v311_v29 }
  0xce   : > { %v367_v30 = vpop.permute.xlu1 %366  ;;  %v359_v31 = vpop.permute.xlu0 %358 }
  0xcf   : > { %385 = vst.msk [vmem:[#allocation2 + $0x30] sm:$0xff] %vm378_vm5, %v367_v30  ;;  %381 = vst.msk [vmem:[#allocation2 + $0x10] sm:$0xff] %vm378_vm5, %v359_v31 }
  0xd2   : > { %v514_v32 = vpop.permute.xlu1 %513  ;;  %v506_v33 = vpop.permute.xlu0 %505 }
  0xd3   : > { %533 = vst.msk [vmem:[#allocation2 + $0x28] sm:$0xff] %vm527_vm8, %v514_v32  ;;  %529 = vst.msk [vmem:[#allocation2 + $0x8] sm:$0xff] %vm527_vm8, %v506_v33 }
  0xd6   : > { %v561_v34 = vpop.permute.xlu1 %560  ;;  %v553_v35 = vpop.permute.xlu0 %552 }
  0xd7   : > { %581 = vst.msk [vmem:[#allocation2 + $0x20] sm:$0xff] %vm576_vm9, %v561_v34  ;;  %577 = vst.msk [vmem:[#allocation2] sm:$0xff] %vm576_vm9, %v553_v35 }
  0xda   : > { %v369_v36 = vpop.permute.xlu1 %368  ;;  %v361_v37 = vpop.permute.xlu0 %360 }
  0xdb   : > { %386 = vst.msk [vmem:[#allocation2 + $0x38] sm:$0xff] %vm378_vm5, %v369_v36  ;;  %382 = vst.msk [vmem:[#allocation2 + $0x18] sm:$0xff] %vm378_vm5, %v361_v37 }
  0xde   : > { %v416_v38 = vpop.permute.xlu1 %415  ;;  %v408_v39 = vpop.permute.xlu0 %407  ;;  %v585_v40 = vld [vmem:[#allocation2] sm:$0xff] }
  0xdf   : > { %v589_v41 = vld [vmem:[#allocation2 + $0x20] sm:$0xff]  ;;  %434 = vst.msk [vmem:[#allocation2 + $0x30] sm:$0xff] %vm427_vm6, %v416_v38  ;;  %430 = vst.msk [vmem:[#allocation2 + $0x10] sm:$0xff] %vm427_vm6, %v408_v39  ;;  %912 = vmatprep.mubr.msk.f32.mxu0 %vm605_vm10, %v585_v40 }
  0xe0   : > { %918 = vmatprep.mubr.msk.f32.mxu1 %vm605_vm10, %v589_v41 }
  0xe2   : > { %v563_v42 = vpop.permute.xlu1 %562  ;;  %v555_v43 = vpop.permute.xlu0 %554 }
  0xe3   : > { %582 = vst.msk [vmem:[#allocation2 + $0x28] sm:$0xff] %vm576_vm9, %v563_v42  ;;  %578 = vst.msk [vmem:[#allocation2 + $0x8] sm:$0xff] %vm576_vm9, %v555_v43 }
  0xe6   : > { %v418_v44 = vpop.permute.xlu1 %417  ;;  %v410_v45 = vpop.permute.xlu0 %409 }
  0xe7   : > { %435 = vst.msk [vmem:[#allocation2 + $0x38] sm:$0xff] %vm427_vm6, %v418_v44  ;;  %431 = vst.msk [vmem:[#allocation2 + $0x18] sm:$0xff] %vm427_vm6, %v410_v45 }
  0xea   : > { %v466_v46 = vpop.permute.xlu1 %465  ;;  %v458_v47 = vpop.permute.xlu0 %457  ;;  %v586_v48 = vld [vmem:[#allocation2 + $0x8] sm:$0xff] }
  0xeb   : > { %v590_v49 = vld [vmem:[#allocation2 + $0x28] sm:$0xff]  ;;  %484 = vst.msk [vmem:[#allocation2 + $0x30] sm:$0xff] %vm477_vm7, %v466_v46  ;;  %480 = vst.msk [vmem:[#allocation2 + $0x10] sm:$0xff] %vm477_vm7, %v458_v47  ;;  %913 = vmatmul.mubr.msk.f32.vlgmr.msra.gmra.mxu0 %vm605_vm10, %v586_v48 }
  0xec   : > { %919 = vmatmul.mubr.msk.f32.vlgmr.msra.gmra.mxu1 %vm605_vm10, %v590_v49 }
  0xee   : > { %v468_v50 = vpop.permute.xlu1 %467  ;;  %v460_v51 = vpop.permute.xlu0 %459 }
  0xef   : > { %485 = vst.msk [vmem:[#allocation2 + $0x38] sm:$0xff] %vm477_vm7, %v468_v50  ;;  %481 = vst.msk [vmem:[#allocation2 + $0x18] sm:$0xff] %vm477_vm7, %v460_v51 }
  0xf2   : > { %v516_v52 = vpop.permute.xlu1 %515  ;;  %v508_v53 = vpop.permute.xlu0 %507 }
  0xf3   : > { %534 = vst.msk [vmem:[#allocation2 + $0x30] sm:$0xff] %vm527_vm8, %v516_v52  ;;  %530 = vst.msk [vmem:[#allocation2 + $0x10] sm:$0xff] %vm527_vm8, %v508_v53 }
  0xf6   : > { %v518_v54 = vpop.permute.xlu1 %517  ;;  %v510_v55 = vpop.permute.xlu0 %509 }
  0xf7   : > { %535 = vst.msk [vmem:[#allocation2 + $0x38] sm:$0xff] %vm527_vm8, %v518_v54  ;;  %531 = vst.msk [vmem:[#allocation2 + $0x18] sm:$0xff] %vm527_vm8, %v510_v55 }
  0xfa   : > { %v565_v56 = vpop.permute.xlu1 %564  ;;  %v557_v57 = vpop.permute.xlu0 %556 }
  0xfb   : > { %583 = vst.msk [vmem:[#allocation2 + $0x30] sm:$0xff] %vm576_vm9, %v565_v56  ;;  %579 = vst.msk [vmem:[#allocation2 + $0x10] sm:$0xff] %vm576_vm9, %v557_v57 }
  0xfe   : > { %v567_v58 = vpop.permute.xlu1 %566  ;;  %v559_v59 = vpop.permute.xlu0 %558 }
  0xff   : > { %584 = vst.msk [vmem:[#allocation2 + $0x38] sm:$0xff] %vm576_vm9, %v567_v58  ;;  %580 = vst.msk [vmem:[#allocation2 + $0x18] sm:$0xff] %vm576_vm9, %v559_v59 }
 0x102   : > { %v587_v60 = vld [vmem:[#allocation2 + $0x10] sm:$0xff] }
 0x103   : > { %v591_v61 = vld [vmem:[#allocation2 + $0x30] sm:$0xff]  ;;  %915 = vmatprep.mubr.msk.f32.mxu0 %vm605_vm10, %v587_v60 }
 0x104   : > { %921 = vmatprep.mubr.msk.f32.mxu1 %vm605_vm10, %v591_v61 }
 0x106   : > { %v588_v62 = vld [vmem:[#allocation2 + $0x18] sm:$0xff] }
 0x107   : > { %v592_v63 = vld [vmem:[#allocation2 + $0x38] sm:$0xff]  ;;  %916 = vmatmul.mubr.msk.f32.gmra.mxu0 %vm605_vm10, %v588_v62 }
 0x108   : > { %922 = vmatmul.mubr.msk.f32.gmra.mxu1 %vm605_vm10, %v592_v63 }
 0x1ab   : > { %v914_v1 = vpop.f32.mrf.mxu0 }
 0x1ac   : > { %v920_v2 = vpop.f32.mrf.mxu1  ;;  %v706_v3 = vadd.f32 %v914_v1, %v876_v0 }
 0x1ad   : > { %v726_v4 = vadd.f32 %v920_v2, %v876_v0  ;;  %v700_v5 = vpop.f32.mrf.mxu0 }
 0x1ae   : > { %v720_v6 = vpop.f32.mrf.mxu1  ;;  %v740_v7 = vmax.f32 %v706_v3, 0.0  ;;  %v701_v9 = vadd.f32 %v876_v0, %v700_v5 }
 0x1af   : > { %v744_v8 = vmax.f32 %v726_v4, 0.0  ;;  %v721_v10 = vadd.f32 %v876_v0, %v720_v6 }
 0x1b0   : > { %749 = vst.msk [vmem:[%s170_s16 + $0x8] sm:$0xff] %vm747_vm11, %v740_v7  ;;  %v739_v11 = vmax.f32 %v701_v9, 0.0 }
 0x1b1   : > { %753 = vst.msk [vmem:[%s170_s16 + $0x28] sm:$0xff] %vm747_vm11, %v744_v8  ;;  %v743_v12 = vmax.f32 %v721_v10, 0.0 }
 0x1b2   : > { %748 = vst.msk [vmem:[%s170_s16] sm:$0xff] %vm747_vm11, %v739_v11 }
 0x1b3   : > { %752 = vst.msk [vmem:[%s170_s16 + $0x20] sm:$0xff] %vm747_vm11, %v743_v12 }
 0x1c7   : > { %v917_v13 = vpop.f32.mrf.mxu0 }
 0x1c8   : > { %v923_v14 = vpop.f32.mrf.mxu1  ;;  %v716_v15 = vadd.f32 %v917_v13, %v876_v0 }
 0x1c9   : > { %v736_v16 = vadd.f32 %v923_v14, %v876_v0  ;;  %v710_v17 = vpop.f32.mrf.mxu0 }
 0x1ca   : > { %v730_v18 = vpop.f32.mrf.mxu1  ;;  %v742_v19 = vmax.f32 %v716_v15, 0.0  ;;  %v711_v21 = vadd.f32 %v876_v0, %v710_v17 }
 0x1cb   : > { %v746_v20 = vmax.f32 %v736_v16, 0.0  ;;  %v731_v22 = vadd.f32 %v876_v0, %v730_v18 }
 0x1cc   : > { %751 = vst.msk [vmem:[%s170_s16 + $0x18] sm:$0xff] %vm747_vm11, %v742_v19  ;;  %v741_v23 = vmax.f32 %v711_v21, 0.0 }
 0x1cd   : > { %755 = vst.msk [vmem:[%s170_s16 + $0x38] sm:$0xff] %vm747_vm11, %v746_v20  ;;  %v745_v24 = vmax.f32 %v731_v22, 0.0 }
 0x1ce   : > { %750 = vst.msk [vmem:[%s170_s16 + $0x10] sm:$0xff] %vm747_vm11, %v741_v23 }
 0x1cf   : > { %754 = vst.msk [vmem:[%s170_s16 + $0x30] sm:$0xff] %vm747_vm11, %v745_v24 }
 0x1d0 PF: > { %s13_s12 = sadd.s32 1, %s957_s12  }
 0x1d1   : > { %p10_p4 = scmp.ge.s32.totalorder %s13_s12, 4  }
 0x1d3   :  { %12 = sbr.rel (!%p10_p4) target bundleno = 1 (0x1), region = 67 }

</bundles_post_ra>
